<compile_context>
chip_gen: v5e
topology: v5e:2x2
jax: 0.10.0
libtpu: 0.0.40
codegen_flags: <defaults>
</compile_context>

<pallas_src>
import functools

import jax
import jax.numpy as jnp
from jax.experimental import pallas as pl
from jax.experimental.pallas import tpu as pltpu

_LANE = 128
_SUBLANE = 8
_MAX_CLASS_TILE = 2048   # class-tile width once C is split over multiple blocks
_MAX_ROW_TILE = 8192


def _ls_ce_kernel(x_ref, t_ref, o_ref, *scratch, smooth, n_total, c_total,
                  block_rows, block_classes, multi_k, use_mxu,
                  mask_rows, mask_cols):
    i = pl.program_id(0)
    k = pl.program_id(1)
    f32 = jnp.float32

    x = x_ref[...]                                   # (TN, TC), input dtype
    tn, tc = x.shape
    t = t_ref[...]                                   # (TN, 1) int32

    # Global class index of every column of this tile (for the one-hot gather
    # and for masking the padded tail of a partial class block).
    col = jax.lax.broadcasted_iota(jnp.int32, (tn, tc), 1)
    if multi_k:
        col = col + k * block_classes

    if mask_cols:
        col_ok = col < c_total
        # Masked columns -> dtype min so exp() underflows to exactly 0.
        x_max_in = jnp.where(col_ok, x, float(jnp.finfo(x.dtype).min))
        x_sum_in = jnp.where(col_ok, x, 0.0)
    else:
        x_max_in = x
        x_sum_in = x

    # x[row, target[row]] as a one-hot select (TPU-friendly gather).
    x_tgt_in = jnp.where(col == t, x, 0.0)

    # Row max: the only lane reduction kept on the XLU (cheap, esp. in bf16).
    m_blk = jnp.max(x_max_in, axis=-1, keepdims=True).astype(f32)    # (TN, 1)

    if multi_k:
        m_sc, l_sc, a_sc = scratch

        @pl.when(k == 0)
        def _init():
            m_sc[...] = jnp.full(m_sc.shape, -jnp.inf, dtype=f32)
            l_sc[...] = jnp.zeros(l_sc.shape, dtype=f32)
            a_sc[...] = jnp.zeros(a_sc.shape, dtype=f32)

        m_prev = m_sc[...]
        m_new = jnp.maximum(m_prev, m_blk)
    else:
        m_new = m_blk

    # exp path in f32, shifted by the running max; masked columns underflow to 0.
    p = jnp.exp(x_max_in.astype(f32) - m_new)                        # (TN, TC) f32

    if use_mxu:
        # Row sums on the (otherwise idle) MXU: bf16 operands, f32 accumulate.
        ones = jnp.ones((tc, _LANE), dtype=jnp.bfloat16)

        def row_sum(v):
            # Every column of the product equals the row sum; take column 0.
            return jnp.dot(v, ones, preferred_element_type=f32)[:, :1]

        sum_x = row_sum(x_sum_in)        # exact: bf16 values * 1.0, f32 acc
        x_tgt = row_sum(x_tgt_in)        # exact: single bf16 value per row
        # exp-sum with a hi/lo bf16 split to keep ~f32 accuracy on the MXU.
        p_hi = p.astype(jnp.bfloat16)
        p_lo = (p - p_hi.astype(f32)).astype(jnp.bfloat16)
        sum_p = row_sum(p_hi) + row_sum(p_lo)
    else:
        # Fallback (e.g. f32 logits): plain XLU lane reductions in f32.
        sum_x = jnp.sum(x_sum_in.astype(f32), axis=-1, keepdims=True)
        x_tgt = jnp.sum(x_tgt_in.astype(f32), axis=-1, keepdims=True)
        sum_p = jnp.sum(p, axis=-1, keepdims=True)

    # Everything linear in x folds into a single running accumulator.
    contrib = (1.0 - smooth) * x_tgt + (smooth / c_total) * sum_x    # (TN, 1) f32

    def _store_partial(m_row, l_row, a_row):
        loss = m_row + jnp.log(l_row) - a_row                        # (TN, 1) f32
        if mask_rows:
            row = i * block_rows + jax.lax.broadcasted_iota(jnp.int32, (tn, 1), 0)
            loss = jnp.where(row < n_total, loss, 0.0)
        partial = jnp.sum(loss, axis=0, keepdims=True)               # (1, 1)
        o_ref[...] = jnp.broadcast_to(partial, o_ref.shape)

    if multi_k:
        alpha = jnp.exp(m_prev - m_new)              # == 0 at k == 0 (m_prev = -inf)
        l_new = alpha * l_sc[...] + sum_p
        a_new = a_sc[...] + contrib
        m_sc[...] = m_new
        l_sc[...] = l_new
        a_sc[...] = a_new

        @pl.when(k == pl.num_programs(1) - 1)
        def _finalize():
            _store_partial(m_new, l_new, a_new)
    else:
        _store_partial(m_new, sum_p, contrib)


def _vmem_budget():
    """(scoped vmem limit, live-bytes budget used to pick the row tile)."""
    try:
        cap = int(pltpu.get_tpu_info().vmem_capacity_bytes)
    except Exception:
        cap = 0
    if cap <= 0:
        cap = 64 * 1024 * 1024            # conservative: v7x has 64 MiB per core
    limit = min(64 * 1024 * 1024, (cap * 3) // 4)   # 64 MiB on v5e/v6e, ~48 MiB on v7x
    budget = min(24 * 1024 * 1024, limit // 2)
    return limit, budget


def _pick_tiles(n, c, dtype, block_rows, block_classes, budget):
    itemsize = jnp.dtype(dtype).itemsize
    lane_pad = _LANE * 4                  # a (TN, 1) 32-bit column costs 512 B/row in VMEM

    if block_classes is None:
        block_classes = _MAX_CLASS_TILE
    if c <= block_classes:
        tc = c                            # full class dim in one block
    else:
        tc = max(_LANE, (block_classes // _LANE) * _LANE)
    multi_k = tc < c

    # Live bytes per block row: double-buffered x, lane-padded target block,
    # in-kernel temporaries (iota, masked copies, p, hi/lo splits), and the
    # online accumulators when the class axis is blocked.
    per_row = 2 * tc * itemsize + 2 * lane_pad + 24 * tc
    if multi_k:
        per_row += 3 * lane_pad

    if block_rows is None:
        usable = max(4 * 1024 * 1024, budget - (1 << 20))   # ~1 MiB fixed overheads
        block_rows = max(_SUBLANE, usable // per_row)
    tn = int(min(block_rows, _MAX_ROW_TILE))
    if tn >= n:
        tn = n
    else:
        tn = max(_SUBLANE, (tn // _SUBLANE) * _SUBLANE)
    return tn, tc, multi_k


def label_smoothing_cross_entropy(x, target, smooth=0.2,
                                  block_rows=None, block_classes=None):
    """x: (N, C) float logits (bf16/f32); target: (N,) int class indices."""
    n, c = x.shape
    t2d = target.astype(jnp.int32).reshape(n, 1)

    vmem_limit, budget = _vmem_budget()
    tn, tc, multi_k = _pick_tiles(n, c, x.dtype, block_rows, block_classes, budget)
    grid_n = pl.cdiv(n, tn)
    grid_k = pl.cdiv(c, tc)

    kernel = functools.partial(
        _ls_ce_kernel,
        smooth=float(smooth),
        n_total=n,
        c_total=c,
        block_rows=tn,
        block_classes=tc,
        multi_k=multi_k,
        use_mxu=(x.dtype == jnp.bfloat16),
        mask_rows=(n % tn != 0),
        mask_cols=(c % tc != 0),
    )
    scratch_shapes = []
    if multi_k:
        scratch_shapes = [pltpu.VMEM((tn, 1), jnp.float32) for _ in range(3)]

    partials = pl.pallas_call(
        kernel,
        out_shape=jax.ShapeDtypeStruct((_SUBLANE * grid_n, _LANE), jnp.float32),
        grid=(grid_n, grid_k),
        in_specs=[
            pl.BlockSpec((tn, tc), lambda i, k: (i, k)),
            # TODO(synk): switch targets to a lane-dense (grid_n, TN) layout
            # (plus an in-kernel transpose) to avoid the 512 B/row lane padding
            # of this block; its VMEM cost is charged in _pick_tiles for now.
            pl.BlockSpec((tn, 1), lambda i, k: (i, 0)),
        ],
        out_specs=pl.BlockSpec((_SUBLANE, _LANE), lambda i, k: (i, 0)),
        scratch_shapes=scratch_shapes,
        compiler_params=pltpu.CompilerParams(
            dimension_semantics=("parallel", "arbitrary"),
            vmem_limit_bytes=vmem_limit,
        ),
    )(x, t2d)

    # Every element of an (8, 128) partial block holds that block's row-sum, so
    # a dense full-array reduce (fuses/vectorizes well) divided by 8*128 gives
    # the total; divide by N for the batch mean.
    return jnp.sum(partials) * (1.0 / (_SUBLANE * _LANE * n))


def _reference(x, target, smooth=0.2):
    confidence = 1.0 - smooth
    logprobs = jax.nn.log_softmax(x.astype(jnp.float32), axis=-1)
    nll = -jnp.take_along_axis(
        logprobs, target[:, None].astype(jnp.int32), axis=-1)[:, 0]
    smooth_loss = -jnp.mean(logprobs, axis=-1)
    return jnp.mean(confidence * nll + smooth * smooth_loss)


if __name__ == "__main__":
    root = jax.random.PRNGKey(0)
    k1, k2, k3, k4, k5, k6 = jax.random.split(root, 6)

    # 1) bf16 logits, partial last row block (N % block_rows != 0):
    #    exercises the MXU reduction path + row masking.
    n1, c1 = 20, 128
    x1 = jax.random.normal(k1, (n1, c1), dtype=jnp.float32).astype(jnp.bfloat16)
    t1 = jax.random.randint(k2, (n1,), 0, c1, dtype=jnp.int32)
    out1 = jax.block_until_ready(
        label_smoothing_cross_entropy(x1, t1, smooth=0.2, block_rows=8))
    ref1 = _reference(x1, t1, smooth=0.2)
    assert jnp.allclose(out1, ref1, atol=2e-4, rtol=2e-4), (out1, ref1)

    # 2) f32 logits, tiny C (single full block): exercises the XLU fallback.
    n2, c2 = 8, 32
    x2 = jax.random.normal(k3, (n2, c2), dtype=jnp.float32)
    t2 = jax.random.randint(k4, (n2,), 0, c2, dtype=jnp.int32)
    out2 = jax.block_until_ready(label_smoothing_cross_entropy(x2, t2, smooth=0.2))
    ref2 = _reference(x2, t2, smooth=0.2)
    assert jnp.allclose(out2, ref2, atol=1e-5, rtol=1e-5), (out2, ref2)

    # 3) bf16 logits with the class axis blocked (online flash-LSE path),
    #    including a partial last class block (C % block_classes != 0).
    n3, c3 = 16, 320
    x3 = jax.random.normal(k5, (n3, c3), dtype=jnp.float32).astype(jnp.bfloat16)
    t3 = jax.random.randint(k6, (n3,), 0, c3, dtype=jnp.int32)
    out3 = jax.block_until_ready(
        label_smoothing_cross_entropy(x3, t3, smooth=0.2,
                                      block_rows=8, block_classes=128))
    ref3 = _reference(x3, t3, smooth=0.2)
    assert jnp.allclose(out3, ref3, atol=2e-4, rtol=2e-4), (out3, ref3)

    print("KERNEL_OK")
</pallas_src>

<mosaic_0001>
module attributes {stable_mosaic.version = 11 : i64} {
  func.func @_ls_ce_kernel(%arg0: i32, %arg1: i32, %arg2: memref<8x128xbf16, #tpu.memory_space<vmem>>, %arg3: memref<8x1xi32, #tpu.memory_space<vmem>>, %arg4: memref<8x128xf32, #tpu.memory_space<vmem>>) attributes {dimension_semantics = [#tpu.dimension_semantics<parallel>, #tpu.dimension_semantics<arbitrary>], iteration_bounds = array<i64: 3, 1>, scalar_prefetch = 0 : i64, scratch_operands = 0 : i64, tpu.core_type = #tpu.core_type<tc>, window_params = [{transform_indices = @transform_0, window_bounds = array<i64: 8, 128>}, {transform_indices = @transform_1, window_bounds = array<i64: 8, 1>}, {transform_indices = @transform_2, window_bounds = array<i64: 8, 128>}]} {
    %c0 = arith.constant 0 : index
    %c0_0 = arith.constant 0 : index
    %0 = vector.load %arg2[%c0, %c0_0] : memref<8x128xbf16, #tpu.memory_space<vmem>>, vector<8x128xbf16>
    %c0_1 = arith.constant 0 : index
    %c0_2 = arith.constant 0 : index
    %1 = vector.load %arg3[%c0_1, %c0_2] : memref<8x1xi32, #tpu.memory_space<vmem>>, vector<8x1xi32>
    %2 = tpu.iota {dimensions = array<i32: 1>} : vector<8x128xi32>
    %3 = vector.broadcast %1 : vector<8x1xi32> to vector<8x128xi32>
    %4 = arith.cmpi eq, %2, %3 : vector<8x128xi32>
    %cst = arith.constant 0.000000e+00 : f32
    %5 = arith.truncf %cst : f32 to bf16
    %6 = vector.broadcast %5 : bf16 to vector<8x128xbf16>
    %7 = arith.select %4, %0, %6 : vector<8x128xi1>, vector<8x128xbf16>
    %cst_3 = arith.constant dense<0xFF80> : vector<8xbf16>
    %8 = vector.multi_reduction <maximumf>, %0, %cst_3 [1] : vector<8x128xbf16> to vector<8xbf16>
    %9 = vector.shape_cast %8 : vector<8xbf16> to vector<8x1xbf16>
    %10 = arith.extf %9 : vector<8x1xbf16> to vector<8x1xf32>
    %11 = arith.extf %0 : vector<8x128xbf16> to vector<8x128xf32>
    %12 = vector.broadcast %10 : vector<8x1xf32> to vector<8x128xf32>
    %13 = arith.subf %11, %12 : vector<8x128xf32>
    %14 = math.exp %13 : vector<8x128xf32>
    %cst_4 = arith.constant 1.000000e+00 : bf16
    %15 = vector.broadcast %cst_4 : bf16 to vector<128x128xbf16>
    %cst_5 = arith.constant dense<0.000000e+00> : vector<8x128xf32>
    %16 = tpu.matmul %0, %15, %cst_5 {dimension_numbers = #tpu.dot_dimension_numbers<[1], [0], [0], [1], [0, 0, 1, 1], [], []>} : vector<8x128xbf16>, vector<128x128xbf16>, vector<8x128xf32> -> vector<8x128xf32>
    %17 = vector.extract_strided_slice %16 {offsets = [0, 0], sizes = [8, 1], strides = [1, 1]} : vector<8x128xf32> to vector<8x1xf32>
    %cst_6 = arith.constant dense<0.000000e+00> : vector<8x128xf32>
    %18 = tpu.matmul %7, %15, %cst_6 {dimension_numbers = #tpu.dot_dimension_numbers<[1], [0], [0], [1], [0, 0, 1, 1], [], []>} : vector<8x128xbf16>, vector<128x128xbf16>, vector<8x128xf32> -> vector<8x128xf32>
    %19 = vector.extract_strided_slice %18 {offsets = [0, 0], sizes = [8, 1], strides = [1, 1]} : vector<8x128xf32> to vector<8x1xf32>
    %20 = arith.truncf %14 : vector<8x128xf32> to vector<8x128xbf16>
    %21 = arith.extf %20 : vector<8x128xbf16> to vector<8x128xf32>
    %22 = arith.subf %14, %21 : vector<8x128xf32>
    %23 = arith.truncf %22 : vector<8x128xf32> to vector<8x128xbf16>
    %cst_7 = arith.constant dense<0.000000e+00> : vector<8x128xf32>
    %24 = tpu.matmul %20, %15, %cst_7 {dimension_numbers = #tpu.dot_dimension_numbers<[1], [0], [0], [1], [0, 0, 1, 1], [], []>} : vector<8x128xbf16>, vector<128x128xbf16>, vector<8x128xf32> -> vector<8x128xf32>
    %25 = vector.extract_strided_slice %24 {offsets = [0, 0], sizes = [8, 1], strides = [1, 1]} : vector<8x128xf32> to vector<8x1xf32>
    %cst_8 = arith.constant dense<0.000000e+00> : vector<8x128xf32>
    %26 = tpu.matmul %23, %15, %cst_8 {dimension_numbers = #tpu.dot_dimension_numbers<[1], [0], [0], [1], [0, 0, 1, 1], [], []>} : vector<8x128xbf16>, vector<128x128xbf16>, vector<8x128xf32> -> vector<8x128xf32>
    %27 = vector.extract_strided_slice %26 {offsets = [0, 0], sizes = [8, 1], strides = [1, 1]} : vector<8x128xf32> to vector<8x1xf32>
    %28 = arith.addf %25, %27 : vector<8x1xf32>
    %cst_9 = arith.constant 8.000000e-01 : f32
    %29 = vector.broadcast %cst_9 : f32 to vector<8x1xf32>
    %30 = arith.mulf %29, %19 : vector<8x1xf32>
    %cst_10 = arith.constant 1.562500e-03 : f32
    %31 = vector.broadcast %cst_10 : f32 to vector<8x1xf32>
    %32 = arith.mulf %31, %17 : vector<8x1xf32>
    %33 = arith.addf %30, %32 : vector<8x1xf32>
    %34 = math.log %28 : vector<8x1xf32>
    %35 = arith.addf %10, %34 : vector<8x1xf32>
    %36 = arith.subf %35, %33 : vector<8x1xf32>
    %c8_i32 = arith.constant 8 : i32
    %37 = arith.muli %arg0, %c8_i32 : i32
    %38 = tpu.iota {dimensions = array<i32: 0>} : vector<8x1xi32>
    %39 = vector.broadcast %37 : i32 to vector<8x1xi32>
    %40 = arith.addi %39, %38 : vector<8x1xi32>
    %c20_i32 = arith.constant 20 : i32
    %41 = vector.broadcast %c20_i32 : i32 to vector<8x1xi32>
    %42 = arith.cmpi slt, %40, %41 : vector<8x1xi32>
    %cst_11 = arith.constant 0.000000e+00 : f32
    %43 = vector.broadcast %cst_11 : f32 to vector<8x1xf32>
    %44 = arith.select %42, %36, %43 : vector<8x1xi1>, vector<8x1xf32>
    %cst_12 = arith.constant dense<0.000000e+00> : vector<1xf32>
    %45 = vector.multi_reduction <add>, %44, %cst_12 [0] : vector<8x1xf32> to vector<1xf32>
    %46 = vector.shape_cast %45 : vector<1xf32> to vector<1x1xf32>
    %47 = vector.shape_cast %46 : vector<1x1xf32> to vector<1x1xf32>
    %48 = vector.broadcast %47 : vector<1x1xf32> to vector<8x128xf32>
    %c0_13 = arith.constant 0 : index
    %c0_14 = arith.constant 0 : index
    %49 = vector.load %arg4[%c0_13, %c0_14] : memref<8x128xf32, #tpu.memory_space<vmem>>, vector<8x128xf32>
    tpu.vector_store %arg4[%c0_13, %c0_14], %48 {strides = array<i32>} : memref<8x128xf32, #tpu.memory_space<vmem>>, vector<8x128xf32>,
    return
  }
  func.func @transform_0(%arg0: i32, %arg1: i32) -> (i32, i32) {
    %c0_i32 = arith.constant 0 : i32
    return %arg0, %arg1 : i32, i32
  }
  func.func @transform_1(%arg0: i32, %arg1: i32) -> (i32, i32) {
    %c0_i32 = arith.constant 0 : i32
    %c0_i32_0 = arith.constant 0 : i32
    return %arg0, %c0_i32 : i32, i32
  }
  func.func @transform_2(%arg0: i32, %arg1: i32) -> (i32, i32) {
    %c0_i32 = arith.constant 0 : i32
    %c0_i32_0 = arith.constant 0 : i32
    return %arg0, %c0_i32 : i32, i32
  }
}

</mosaic_0001>

<bundles_post_ra>
// kernel: tpu_custom_call.1
= control target key start
LH: loop header
LB: loop body
LE: loop exit
PB: predicated region body
PF: predicated region fallthrough
CT: control target
= control target key end

     0   :  { %7 = vsyncpa [#allocation3], 0  ;;  %s659_s0 = inlined_call_operand.vmem [shape: bf16[20,128], index: 0, kind: input, shape index: {}]   ;;  %s660_s1 = inlined_call_operand.vmem [shape: s32[20,1], index: 1, kind: input, shape index: {}]   ;;  %s661_s2 = inlined_call_operand.hbm [shape: f32[24,128], index: 2, kind: output, shape index: {}]  }
   0x1   :  { %9 = vsyncpa [#allocation3 + $0x1], 0  ;;  %s555_s9 = smov 0   ;;  %s557_s10 = smov 0  }
   0x2   :  { %s559_s11 = smov 0   ;;  %s561_s12 = smov 0  }
   0x3   :  { %s563_s13 = smov 0   ;;  %s565_s14 = smov 0  }
   0x4 LB: > { %s382_s15 = sadd.s32 4294967295, %s536_s14   ;;  %s383_s16 = sadd.s32 4294967294, %s536_s14   ;;  %s536_s14 = sphi %s565_s14, %s15_s14   ;;  %s532_s13 = sphi %s563_s13, %s668_s13   ;;  %s528_s12 = sphi %s561_s12, %s667_s12   ;;  %s524_s11 = sphi %s559_s11, %s666_s11   ;;  %s520_s10 = sphi %s557_s10, %s665_s10   ;;  %s516_s9 = sphi %s555_s9, %s664_s9  }
   0x5   : > { %s27_s17 = sadd.s32 1, %s532_s13  ;;  %s88_s18 = sadd.s32 1, %s524_s11 }
   0x6   : > { %p29_p0 = scmp.ge.s32.totalorder %s27_s17, 3  ;;  %p98_p1 = scmp.ne.s32.totalorder %s524_s11, %s520_s10 }
   0x7   : > { %p99_p2 = scmp.eq.s32.totalorder %s382_s15, 2  ;;  %p104_p3 = scmp.ne.s32.totalorder %s520_s10, %s516_s9 }
   0x8   : > { %s670_s17 = smov (%p29_p0, %s27_s17), 0  ;;  %p105_p5 = scmp.eq.s32.totalorder %s383_s16, 2 }
   0x9   : > { %p595_p4 = por %p99_p2, %p98_p1  ;;  %s85_s20 = ssub.s32 %s532_s13, %s670_s17 }
   0xa   : > { %p386_p6 = scmp.ge.s32.totalorder %s536_s14, 1  ;;  %p86_p7 = scmp.eq.s32.totalorder %s85_s20, 0 }
   0xb   : > { %p602_p8 = por %p105_p5, %p104_p3  ;;  %p140_p9 = scmp.lt.s32.totalorder %s536_s14, 4 }
   0xc   : > { %s608_s22 = scalar_select %p86_p7, %s524_s11, %s88_s18  }
   0xd   : > { %p141_p10 = pnand %p386_p6, %p140_p9 }
   0xe   : > { %p168_p11 = scmp.lt.s32.totalorder (!%p141_p10), %s528_s12, 2  ;;  %s390_s4 = sshll.u32 (!%p141_p10), %s528_s12, 3 }
   0xf   : > { %144 = sbr.rel (%p141_p10) target bundleno = 445 (0x1bd), region = 28  ;;  %s165_s5 = sand.u32 (!%p141_p10), 1, %s520_s10  }
  0x10   : > { %s387_s6 = sshll.u32 (!%p141_p10), %s165_s5, 3  ;;  %s285_s20 = scalar_lea.sflag (!%p141_p10), [#allocation3], %s165_s5 }
  0x11   : > { %s167_s15 = scalar_lea.vmem (!%p141_p10), [#allocation2], %s387_s6 }
  0x12   : > { %s297_s16 = sshll.u32 (!%p141_p10), %s167_s15, 4  ;;  %s298_s16 = int_to_ptr.vmem [resolvable:$true] %s297_s16 }
  0x14   : > { %v538_v0 = vmov 0   ;;  %v539_v1 = vmov 1065369472   ;;  %s612_s23 = scalar_select %p168_p11, %s528_s12, 2  ;;  %v183_v10 = vlaneseq  ;;  %v266_v30 = vstv %s390_s4 }
  0x15   : > { %452 = vset.pattern.permute.xlu0 %v538_v0  ;;  %229 = vmatpush.bf16.msra.mxu2 %v539_v1  ;;  %vm270_vm3 = vcmask 7168   ;;  %s295_s12 = scalar_lea.hbm %s661_s2, %s390_s4 }
  0x16   : > { %242 = vmatpush.bf16.msra.mxu3 %v539_v1  ;;  %199 = vmatpush.bf16.msra.mxu0 %v539_v1  ;;  %s388_s24 = sshll.u32 %s612_s23, 2  ;;  %s389_s28 = sshll.u32 %s612_s23, 3  ;;  %v184_v13 = vand.u32 127, %v183_v10  ;;  %v265_v27 = vshrl.u32 %v183_v10, 7 }
  0x17   : > { %212 = vmatpush.bf16.msra.mxu1 %v539_v1  ;;  %453 = vset.pattern.permute.xlu1 %v538_v0  ;;  %s174_s27 = scalar_lea.vmem %s659_s0, %s388_s24  ;;  %s178_s3 = scalar_lea.vmem %s660_s1, %s389_s28 }
  0x18   : > { %v181_v2 = vld [vmem:[%s174_s27] sm:$0xf]  ;;  %v267_v33 = vadd.s32 %v266_v30, %v265_v27  ;;  %s299_s18 = sshll.u32 %s295_s12, 4  ;;  %s478_s27 = scalar_lea.hbm %s661_s2, 24  ;;  %s300_s18 = int_to_ptr.hbm [resolvable:$true] %s299_s18 }
  0x19   : > { %230 = vmatpush.bf16.msra.mxu2 %v539_v1  ;;  %v191_v3 = vunpack.c.l.bf16 %v181_v2  ;;  %v182_v4 = vld [vmem:[%s178_s3] sm:$0xff]  ;;  %s472_s23 = sshra.s32 %s300_s18, 4  ;;  %s473_s23 = int_to_ptr.hbm [resolvable:$true] %s472_s23 }
  0x1a   : > { %243 = vmatpush.bf16.msra.mxu3 %v539_v1  ;;  %200 = vmatpush.bf16.msra.mxu0 %v539_v1  ;;  %vm268_vm2 = vcmp.lt.s32.totalorder %v267_v33, 20  ;;  %s474_s24 = scalar_lea.hbm %s473_s23, 8  ;;  %p479_p1 = scmp.lt.s32.totalorder %s473_s23, %s661_s2 }
  0x1b   : > { %213 = vmatpush.bf16.msra.mxu1 %v539_v1  ;;  %192 = vmax.xlane.f32.xlu0 %v191_v3  ;;  %p475_p12 = scmp.ne.s32.totalorder %s473_s23, %s474_s24  ;;  %p480_p2 = scmp.lt.s32.totalorder %s478_s27, %s474_s24 }
  0x1d   : > { %231 = vmatpush.bf16.msra.mxu2 %v539_v1  ;;  %p476_p13 = pnand %p475_p12, %p595_p4  ;;  %p481_p3 = por %p480_p2, %p479_p1 }
  0x1e   : > { %244 = vmatpush.bf16.msra.mxu3 %v539_v1  ;;  %201 = vmatpush.bf16.msra.mxu0 %v539_v1 }
  0x1f   : > { %214 = vmatpush.bf16.msra.mxu1 %v539_v1  ;;  %p477_p0 = pneg %p476_p13 }
  0x21   : > { %232 = vmatpush.bf16.msra.mxu2 %v539_v1  ;;  %p482_p5 = pnand %p481_p3, %p477_p0 }
  0x22   : > { %245 = vmatpush.bf16.msra.mxu3 %v539_v1  ;;  %202 = vmatpush.bf16.msra.mxu0 %v539_v1 }
  0x23   : > { %215 = vmatpush.bf16.msra.mxu1 %v539_v1 }
  0x25   : > { %233 = vmatpush.bf16.msra.mxu2 %v539_v1 }
  0x26   : > { %246 = vmatpush.bf16.msra.mxu3 %v539_v1  ;;  %203 = vmatpush.bf16.msra.mxu0 %v539_v1 }
  0x27   : > { %216 = vmatpush.bf16.msra.mxu1 %v539_v1 }
  0x29   : > { %234 = vmatpush.bf16.msra.mxu2 %v539_v1 }
  0x2a   : > { %247 = vmatpush.bf16.msra.mxu3 %v539_v1  ;;  %204 = vmatpush.bf16.msra.mxu0 %v539_v1 }
  0x2b   : > { %217 = vmatpush.bf16.msra.mxu1 %v539_v1 }
  0x2d   : > { %235 = vmatpush.bf16.msra.mxu2 %v539_v1 }
  0x2e   : > { %248 = vmatpush.bf16.msra.mxu3 %v539_v1  ;;  %205 = vmatpush.bf16.msra.mxu0 %v539_v1 }
  0x2f   : > { %218 = vmatpush.bf16.msra.mxu1 %v539_v1  ;;  %186 = vperm.xlu0 %452, %v182_v4  }
  0x31   : > { %236 = vmatpush.bf16.msra.mxu2 %v539_v1 }
  0x32   : > { %249 = vmatpush.bf16.msra.mxu3 %v539_v1  ;;  %206 = vmatpush.bf16.msra.mxu0 %v539_v1 }
  0x33   : > { %219 = vmatpush.bf16.msra.mxu1 %v539_v1 }
  0x35   : > { %207 = vmatmul.bf16.vlgmr.msra.gmra.mxu0 %v181_v2 }
  0x8e   : > { %v193_v5 = vpop.xlane.xlu0 %192 }
  0x8f   : > { %v194_v6 = vpack.c.bf16 %v193_v5, %v193_v5 }
  0x91   : > { %v195_v7 = vunpack.c.l.bf16 %v194_v6 }
  0x93   : > { %v196_v8 = vsub.f32 %v191_v3, %v195_v7 }
  0x95   : > { %v197_v9 = vmul.f32 1.442695, %v196_v8 }
  0x97   : > { %454 = vpow2.f32 %v197_v9 }
  0x9d   : > { %v455_v11 = vpop.eup %454 }
  0x9e   : > { %v225_v12 = vpack.c.bf16 %v455_v11, %v455_v11 }
  0xa0   : > { %v226_v14 = vunpack.c.l.bf16 %v225_v12  ;;  %237 = vmatmul.bf16.vlgmr.msra.gmra.mxu2 %v225_v12 }
  0xa1   : > { %v187_v15 = vpop.permute.xlu0 %186 }
  0xa2   : > { %v227_v16 = vsub.f32 %v455_v11, %v226_v14  ;;  %vm188_vm0 = vcmp.eq.s32.totalorder %v184_v13, %v187_v15 }
  0xa3   : > { %vm189_vm1 = vmpackc.low %vm188_vm0, %vm188_vm0 }
  0xa4   : > { %v228_v17 = vpack.c.bf16 %v227_v16, %v227_v16  ;;  %v190_v18 = vsel %vm189_vm1, %v181_v2, 0 }
  0xa5   : > { %220 = vmatmul.bf16.vlgmr.msra.gmra.mxu1 %v190_v18 }
  0xa6   : > { %250 = vmatmul.bf16.vlgmr.msra.gmra.mxu3 %v228_v17 }
  0xb2   : > { %v208_v19 = vpop.f32.mrf.mxu0 }
  0xb3   : > { %v257_v28 = vmul.f32 0.0015625, %v208_v19 }
  0xba   : > { %v210_v20 = vpop.f32.mrf.mxu0 }
 0x122   : > { %v221_v21 = vpop.f32.mrf.mxu1 }
 0x123   : > { %v238_v22 = vpop.f32.mrf.mxu2  ;;  %v256_v29 = vmul.f32 0.8, %v221_v21 }
 0x125   : > { %v258_v35 = vadd.f32 %v257_v28, %v256_v29 }
 0x129   : > { %v251_v23 = vpop.f32.mrf.mxu3 }
 0x12a   : > { %v255_v24 = vadd.f32 %v251_v23, %v238_v22  ;;  %v223_v25 = vpop.f32.mrf.mxu1 }
 0x12b   : > { %v240_v26 = vpop.f32.mrf.mxu2 }
 0x12c   : > { %456 = vlog2.f32 %v255_v24 }
 0x131   : > { %v253_v31 = vpop.f32.mrf.mxu3 }
 0x132   : > { %v457_v32 = vpop.eup %456 }
 0x133   : > { %v260_v34 = vmul.f32 0.6931472, %v457_v32 }
 0x135   : > { %v261_v36 = vadd.f32 %v260_v34, %v195_v7 }
 0x137   : > { %v262_v37 = vsub.f32 %v261_v36, %v258_v35 }
 0x139   : > { %v269_v38 = vsel %vm268_vm2, %v262_v37, 0.0 }
 0x13a   : > { %v271_v39 = vsel %vm270_vm3, %v269_v38, 0.0 }
 0x13b   : > { %v272_v40 = vrot.slane %v271_v39, 4 }
 0x13d   : > { %v273_v41 = vadd.f32 %v272_v40, %v271_v39 }
 0x13f   : > { %v274_v42 = vrot.slane %v273_v41, 2 }
 0x141   : > { %v275_v43 = vadd.f32 %v274_v42, %v273_v41 }
 0x143   : > { %v276_v44 = vrot.slane %v275_v43, 1 }
 0x145   : > { %v277_v45 = vadd.f32 %v276_v44, %v275_v43 }
 0x147   : > { %280 = vperm.xlu1 %453, %v277_v45  }
 0x1b9   : > { %v281_v46 = vpop.permute.xlu1 %280 }
 0x1ba   : > { %283 = vst [vmem:[%s167_s15] sm:$0xff] %v281_v46 }
 0x1bb   : > { %485 = shalt.err (!%p482_p5)
}
 0x1bc   : > { %395 = dma.vmem_to_hbm [thread:$0]  (%p595_p4), %s298_s16, 128, %s300_s18, %s285_s20  }
 0x1bd PF: > { %p401_p6 = scmp.ge.s32.totalorder %s536_s14, 2  ;;  %s311_s30 = sand.u32 1, %s516_s9  }
 0x1be   : > { %s312_s3 = scalar_lea.sflag [#allocation3], %s311_s30 }
 0x1bf   : > { %p398_p7 = pnand %p401_p6, %p602_p8 }
 0x1c1   : > { %p399_p9 = pneg %p398_p7 }
 0x1c3   : > { %511 = dma.done.wait (%p399_p9), %s312_s3, 128  }
 0x1c4   : > { %513 = vsyncadd (%p399_p9), %s312_s3, 4294967168  ;;  %s15_s14 = sadd.s32 1, %s536_s14   ;;  %s664_s9 = smov %s520_s10 }
 0x1c5   : > { %p12_p10 = scmp.ge.s32.totalorder %s15_s14, 5   ;;  %s665_s10 = smov %s524_s11 }
 0x1c6   : > { %s666_s11 = smov %s608_s22  ;;  %s667_s12 = smov %s532_s13 }
 0x1c7   : > { %s668_s13 = smov %s670_s17  ;;  %14 = sbr.rel (!%p12_p10) target bundleno = 4 (0x4), region = 66 }
 0x1cc   :  { %318 = vsyncpa [#allocation3], 1 }
 0x1cd   :  { %320 = vsyncpa [#allocation3 + $0x1], 1 }

</bundles_post_ra>
